<compile_context>
chip_gen: v5e
topology: v5e:2x2
jax: 0.10.0
libtpu: 0.0.40
codegen_flags: <defaults>
</compile_context>

<pallas_src>
import functools

import jax
import jax.numpy as jnp
from jax.experimental import pallas as pl
from jax.experimental.pallas import tpu as pltpu


def _senet_kernel(x_ref, pool_ref, w1t_ref, w2t_ref, expand_ref, o_ref):
    # x_ref:      (tb, F*D)  lane-dense batch tile
    # pool_ref:   (F*D, F)   block-diagonal averaging matrix (entries 1/D)
    # w1t_ref:    (F, R)     first excitation weight, pre-transposed
    # w2t_ref:    (R, F)     second excitation weight, pre-transposed
    # expand_ref: (F, F*D)   0/1 matrix repeating each field's scale across its D lanes
    # o_ref:      (tb, F*D)
    x = x_ref[...]
    # Squeeze: per-field mean over the embedding dim, done as one dense matmul.
    z = jnp.dot(x, pool_ref[...], preferred_element_type=jnp.float32)            # (tb, F)
    # Excitation: two bias-free linears + ReLU.
    h = jnp.maximum(jnp.dot(z, w1t_ref[...], preferred_element_type=jnp.float32), 0.0)
    a = jnp.maximum(jnp.dot(h, w2t_ref[...], preferred_element_type=jnp.float32), 0.0)
    # Re-weight: broadcast each field scale across its D lanes, then elementwise scale x.
    a_full = jnp.dot(a, expand_ref[...], preferred_element_type=jnp.float32)      # (tb, F*D)
    o_ref[...] = (x * a_full).astype(o_ref.dtype)


def _pick_block_b(batch, cap=512):
    """Largest batch tile: whole batch if small, else a multiple-of-8 divisor <= cap."""
    if batch <= cap:
        return batch
    tb = cap - (cap % 8)
    while tb >= 8:
        if batch % tb == 0:
            return tb
        tb -= 8
    return batch  # fallback: single tile


@functools.partial(jax.jit, static_argnames=("block_b",))
def senet_attention(x, w1, w2, *, block_b=None):
    """SENetAttention forward.

    x:  [B, F, D]   (batch, num_fields, d_embed)
    w1: [R, F]      nn.Linear(num_fields -> reduced, bias=False) weight (PyTorch layout)
    w2: [F, R]      nn.Linear(reduced -> num_fields, bias=False) weight (PyTorch layout)
    returns [B, F, D]
    """
    B, F, D = x.shape
    R, F1 = w1.shape
    F2, R2 = w2.shape
    assert F1 == F and F2 == F and R2 == R

    FD = F * D
    if block_b is None:
        block_b = _pick_block_b(B)
    assert B % block_b == 0

    # Constant pool / expand matrices, built once at trace time (outside the kernel).
    eye = jnp.eye(F, dtype=jnp.float32)
    pool = jnp.repeat(eye, D, axis=0) / jnp.float32(D)   # [F*D, F]
    expand = jnp.repeat(eye, D, axis=1)                   # [F, F*D]

    # Lane-dense view of x; transposed weights so the kernel does plain row-major matmuls.
    x2 = x.reshape(B, FD)
    w1t = w1.T.astype(jnp.float32)                        # [F, R]
    w2t = w2.T.astype(jnp.float32)                        # [R, F]

    out2 = pl.pallas_call(
        _senet_kernel,
        out_shape=jax.ShapeDtypeStruct((B, FD), x.dtype),
        grid=(B // block_b,),
        in_specs=[
            pl.BlockSpec((block_b, FD), lambda i: (i, 0)),   # x tile (lane-dense)
            pl.BlockSpec((FD, F), lambda i: (0, 0)),          # pool   (resident)
            pl.BlockSpec((F, R), lambda i: (0, 0)),            # W1^T   (resident)
            pl.BlockSpec((R, F), lambda i: (0, 0)),            # W2^T   (resident)
            pl.BlockSpec((F, FD), lambda i: (0, 0)),           # expand (resident)
        ],
        out_specs=pl.BlockSpec((block_b, FD), lambda i: (i, 0)),
        compiler_params=pltpu.CompilerParams(
            dimension_semantics=("parallel",),
        ),
    )(x2, pool, w1t, w2t, expand)
    return out2.reshape(B, F, D)


def init_senet_params(key, num_fields, reduction_ratio=3, dtype=jnp.float32):
    """Deterministic init mimicking nn.Linear defaults (uniform in +-1/sqrt(fan_in))."""
    reduced = max(1, int(num_fields / reduction_ratio))
    k1, k2 = jax.random.split(key)
    b1 = 1.0 / (num_fields ** 0.5)
    b2 = 1.0 / (reduced ** 0.5)
    w1 = jax.random.uniform(k1, (reduced, num_fields), dtype, -b1, b1)   # Linear(F -> R)
    w2 = jax.random.uniform(k2, (num_fields, reduced), dtype, -b2, b2)   # Linear(R -> F)
    return w1, w2


if __name__ == "__main__":
    key = jax.random.PRNGKey(0)
    kx, kp = jax.random.split(key)

    # Small shapes consistent with the module: [batch, num_fields, d_embed].
    B, F, D = 16, 9, 16
    reduction_ratio = 3

    x = jax.random.normal(kx, (B, F, D), dtype=jnp.float32)
    w1, w2 = init_senet_params(kp, F, reduction_ratio)

    out = senet_attention(x, w1, w2)
    out = jax.block_until_ready(out)

    # Pure-JAX reference for correctness.
    z = jnp.mean(x, axis=-1)
    a = jax.nn.relu(jax.nn.relu(z @ w1.T) @ w2.T)
    ref = x * a[..., None]

    assert out.shape == (B, F, D)
    assert jnp.allclose(out, ref, atol=1e-5, rtol=1e-5)

    print("KERNEL_OK")
</pallas_src>

<mosaic_0001>
module attributes {stable_mosaic.version = 11 : i64} {
  func.func @_senet_kernel(%arg0: i32, %arg1: memref<16x144xf32, #tpu.memory_space<vmem>>, %arg2: memref<144x9xf32, #tpu.memory_space<vmem>>, %arg3: memref<9x3xf32, #tpu.memory_space<vmem>>, %arg4: memref<3x9xf32, #tpu.memory_space<vmem>>, %arg5: memref<9x144xf32, #tpu.memory_space<vmem>>, %arg6: memref<16x144xf32, #tpu.memory_space<vmem>>) attributes {dimension_semantics = [#tpu.dimension_semantics<parallel>], iteration_bounds = array<i64: 1>, scalar_prefetch = 0 : i64, scratch_operands = 0 : i64, tpu.core_type = #tpu.core_type<tc>, window_params = [{transform_indices = @transform_0, window_bounds = array<i64: 16, 144>}, {pipeline_mode = #tpu.pipeline_mode<synchronous>, transform_indices = @transform_1, window_bounds = array<i64: 144, 9>}, {pipeline_mode = #tpu.pipeline_mode<synchronous>, transform_indices = @transform_2, window_bounds = array<i64: 9, 3>}, {pipeline_mode = #tpu.pipeline_mode<synchronous>, transform_indices = @transform_3, window_bounds = array<i64: 3, 9>}, {pipeline_mode = #tpu.pipeline_mode<synchronous>, transform_indices = @transform_4, window_bounds = array<i64: 9, 144>}, {transform_indices = @transform_5, window_bounds = array<i64: 16, 144>}]} {
    %c0 = arith.constant 0 : index
    %c0_0 = arith.constant 0 : index
    %0 = vector.load %arg1[%c0, %c0_0] : memref<16x144xf32, #tpu.memory_space<vmem>>, vector<16x144xf32>
    %c0_1 = arith.constant 0 : index
    %c0_2 = arith.constant 0 : index
    %1 = vector.load %arg2[%c0_1, %c0_2] : memref<144x9xf32, #tpu.memory_space<vmem>>, vector<144x9xf32>
    %cst = arith.constant dense<0.000000e+00> : vector<16x9xf32>
    %2 = tpu.matmul %0, %1, %cst {dimension_numbers = #tpu.dot_dimension_numbers<[1], [0], [0], [1], [0, 0, 1, 1], [], []>} : vector<16x144xf32>, vector<144x9xf32>, vector<16x9xf32> -> vector<16x9xf32>
    %c0_3 = arith.constant 0 : index
    %c0_4 = arith.constant 0 : index
    %3 = vector.load %arg3[%c0_3, %c0_4] : memref<9x3xf32, #tpu.memory_space<vmem>>, vector<9x3xf32>
    %cst_5 = arith.constant dense<0.000000e+00> : vector<16x3xf32>
    %4 = tpu.matmul %2, %3, %cst_5 {dimension_numbers = #tpu.dot_dimension_numbers<[1], [0], [0], [1], [0, 0, 1, 1], [], []>} : vector<16x9xf32>, vector<9x3xf32>, vector<16x3xf32> -> vector<16x3xf32>
    %cst_6 = arith.constant 0.000000e+00 : f32
    %5 = vector.broadcast %cst_6 : f32 to vector<16x3xf32>
    %6 = arith.maximumf %4, %5 : vector<16x3xf32>
    %c0_7 = arith.constant 0 : index
    %c0_8 = arith.constant 0 : index
    %7 = vector.load %arg4[%c0_7, %c0_8] : memref<3x9xf32, #tpu.memory_space<vmem>>, vector<3x9xf32>
    %cst_9 = arith.constant dense<0.000000e+00> : vector<16x9xf32>
    %8 = tpu.matmul %6, %7, %cst_9 {dimension_numbers = #tpu.dot_dimension_numbers<[1], [0], [0], [1], [0, 0, 1, 1], [], []>} : vector<16x3xf32>, vector<3x9xf32>, vector<16x9xf32> -> vector<16x9xf32>
    %cst_10 = arith.constant 0.000000e+00 : f32
    %9 = vector.broadcast %cst_10 : f32 to vector<16x9xf32>
    %10 = arith.maximumf %8, %9 : vector<16x9xf32>
    %c0_11 = arith.constant 0 : index
    %c0_12 = arith.constant 0 : index
    %11 = vector.load %arg5[%c0_11, %c0_12] : memref<9x144xf32, #tpu.memory_space<vmem>>, vector<9x144xf32>
    %cst_13 = arith.constant dense<0.000000e+00> : vector<16x144xf32>
    %12 = tpu.matmul %10, %11, %cst_13 {dimension_numbers = #tpu.dot_dimension_numbers<[1], [0], [0], [1], [0, 0, 1, 1], [], []>} : vector<16x9xf32>, vector<9x144xf32>, vector<16x144xf32> -> vector<16x144xf32>
    %13 = arith.mulf %0, %12 : vector<16x144xf32>
    %c0_14 = arith.constant 0 : index
    %c0_15 = arith.constant 0 : index
    %14 = vector.load %arg6[%c0_14, %c0_15] : memref<16x144xf32, #tpu.memory_space<vmem>>, vector<16x144xf32>
    tpu.vector_store %arg6[%c0_14, %c0_15], %13 {strides = array<i32>} : memref<16x144xf32, #tpu.memory_space<vmem>>, vector<16x144xf32>,
    return
  }
  func.func @transform_0(%arg0: i32) -> (i32, i32) {
    %c0_i32 = arith.constant 0 : i32
    %c0_i32_0 = arith.constant 0 : i32
    return %arg0, %c0_i32 : i32, i32
  }
  func.func @transform_1(%arg0: i32) -> (i32, i32) {
    %c0_i32 = arith.constant 0 : i32
    %c0_i32_0 = arith.constant 0 : i32
    %c0_i32_1 = arith.constant 0 : i32
    return %c0_i32, %c0_i32_0 : i32, i32
  }
  func.func @transform_2(%arg0: i32) -> (i32, i32) {
    %c0_i32 = arith.constant 0 : i32
    %c0_i32_0 = arith.constant 0 : i32
    %c0_i32_1 = arith.constant 0 : i32
    return %c0_i32, %c0_i32_0 : i32, i32
  }
  func.func @transform_3(%arg0: i32) -> (i32, i32) {
    %c0_i32 = arith.constant 0 : i32
    %c0_i32_0 = arith.constant 0 : i32
    %c0_i32_1 = arith.constant 0 : i32
    return %c0_i32, %c0_i32_0 : i32, i32
  }
  func.func @transform_4(%arg0: i32) -> (i32, i32) {
    %c0_i32 = arith.constant 0 : i32
    %c0_i32_0 = arith.constant 0 : i32
    %c0_i32_1 = arith.constant 0 : i32
    return %c0_i32, %c0_i32_0 : i32, i32
  }
  func.func @transform_5(%arg0: i32) -> (i32, i32) {
    %c0_i32 = arith.constant 0 : i32
    %c0_i32_0 = arith.constant 0 : i32
    return %arg0, %c0_i32 : i32, i32
  }
}

</mosaic_0001>

<bundles_post_ra>
// kernel: senet_attention.1
= control target key start
LH: loop header
LB: loop body
LE: loop exit
PB: predicated region body
PF: predicated region fallthrough
CT: control target
= control target key end

     0   :  { %vm42_vm0 = vcmask 130048   ;;  %vm104_vm1 = vcmask 1040384   ;;  %vm97_vm2 = vcmask 72704   ;;  %vm141_vm3 = vcmask 1042432   ;;  %s408_s1 = inlined_call_operand.vmem [shape: f32[144,9], index: 1, kind: input, shape index: {}]   ;;  %s409_s0 = inlined_call_operand.vmem [shape: f32[16,144], index: 0, kind: input, shape index: {}]   ;;  %s410_s2 = inlined_call_operand.vmem [shape: f32[9,3], index: 2, kind: input, shape index: {}]   ;;  %s411_s3 = inlined_call_operand.vmem [shape: f32[3,9], index: 3, kind: input, shape index: {}]   ;;  %s412_s4 = inlined_call_operand.vmem [shape: f32[9,144], index: 4, kind: input, shape index: {}]   ;;  %s413_s5 = inlined_call_operand.vmem [shape: f32[16,144], index: 5, kind: output, shape index: {}]  }
   0x1   :  { %v39_v0 = vld [vmem:[%s408_s1 + $0x78] sm:$0xff]  ;;  %v38_v1 = vld [vmem:[%s408_s1 + $0x70] sm:$0xff]  ;;  %v37_v2 = vld [vmem:[%s408_s1 + $0x68] sm:$0xff]  ;;  %vm134_vm4 = vcmask 23552  }
   0x2   :  { %49 = vmatpush.msra.mxu0 %v39_v0  ;;  %v36_v3 = vld [vmem:[%s408_s1 + $0x60] sm:$0xff]  ;;  %v41_v4 = vld [vmem:[%s408_s1 + $0x88] sm:$0xff]  ;;  %v35_v6 = vld [vmem:[%s408_s1 + $0x58] sm:$0xff] }
   0x3   :  { %v40_v5 = vld [vmem:[%s408_s1 + $0x80] sm:$0xff]  ;;  %86 = vmatpush.msra.mxu1 %v41_v4  ;;  %v312_v7 = vld [vmem:[%s409_s0 + $0x8] sm:$0xff]  ;;  %v34_v8 = vld [vmem:[%s408_s1 + $0x50] sm:$0xff] }
   0x4   :  { %50 = vmatpush.msra.mxu0 %v38_v1  ;;  %v33_v9 = vld [vmem:[%s408_s1 + $0x48] sm:$0xff]  ;;  %v32_v10 = vld [vmem:[%s408_s1 + $0x40] sm:$0xff]  ;;  %v31_v11 = vld [vmem:[%s408_s1 + $0x38] sm:$0xff] }
   0x5   :  { %87 = vmatpush.msra.mxu1 %v40_v5  ;;  %v331_v12 = vld [vmem:[%s409_s0 + $0x18] sm:$0xff]  ;;  %v30_v13 = vld [vmem:[%s408_s1 + $0x30] sm:$0xff]  ;;  %v29_v14 = vld [vmem:[%s408_s1 + $0x28] sm:$0xff] }
   0x6   :  { %51 = vmatpush.msra.mxu0 %v37_v2  ;;  %244 = vmatmul.msk.f32.vlgmr.msra.gmra.mxu1 %vm42_vm0, %v312_v7  ;;  %v28_v15 = vld [vmem:[%s408_s1 + $0x20] sm:$0xff]  ;;  %v27_v16 = vld [vmem:[%s408_s1 + $0x18] sm:$0xff]  ;;  %v26_v17 = vld [vmem:[%s408_s1 + $0x10] sm:$0xff] }
   0x7   :  { %v25_v18 = vld [vmem:[%s408_s1 + $0x8] sm:$0xff]  ;;  %v24_v19 = vld [vmem:[%s408_s1] sm:$0xff]  ;;  %v22_v21 = vld [vmem:[%s409_s0 + $0x10] sm:$0xff] }
   0x8   :  { %52 = vmatpush.msra.mxu0 %v36_v3  ;;  %v20_v20 = vld [vmem:[%s409_s0] sm:$0xff]  ;;  %v96_v22 = vld [vmem:[%s410_s2 + $0x8] sm:$0x1]  ;;  %v172_v31 = vld [vmem:[%s412_s4 + $0x10] sm:$0x1] }
   0x9   :  { %246 = vmatpush.msk.msra.mxu2 %vm104_vm1, %v96_v22  ;;  %v95_v23 = vld [vmem:[%s410_s2] sm:$0xff]  ;;  %v173_v32 = vld [vmem:[%s412_s4 + $0x18] sm:$0x1]  ;;  %v171_v38 = vld [vmem:[%s412_s4 + $0x8] sm:$0xff] }
   0xa   :  { %53 = vmatpush.msra.mxu0 %v35_v6  ;;  %v133_v30 = vld [vmem:[%s411_s3] sm:$0x7]  ;;  %255 = vmatpush.msk.msrb.mxu1 %vm104_vm1, %v173_v32 }
   0xb   :  { %123 = vmatpush.msra.mxu2 %v95_v23  ;;  %249 = vmatpush.msk.msra.mxu3 %vm141_vm3, %v133_v30  ;;  %v170_v33 = vld [vmem:[%s412_s4] sm:$0xff] }
   0xc   :  { %54 = vmatpush.msra.mxu0 %v34_v8  ;;  %224 = vmatpush.msrb.mxu1 %v171_v38 }
   0xd   :  { %252 = vmatpush.msk.msrb.mxu3 %vm104_vm1, %v172_v31 }
   0xe   :  { %55 = vmatpush.msra.mxu0 %v33_v9  ;;  %245 = vmatmul.msk.f32.gmra.mxu1 %vm42_vm0, %v331_v12 }
   0xf   :  { %201 = vmatpush.msrb.mxu3 %v170_v33 }
  0x10   :  { %56 = vmatpush.msra.mxu0 %v32_v10 }
  0x12   :  { %57 = vmatpush.msra.mxu0 %v31_v11 }
  0x14   :  { %58 = vmatpush.msra.mxu0 %v30_v13 }
  0x16   :  { %59 = vmatpush.msra.mxu0 %v29_v14 }
  0x18   :  { %60 = vmatpush.msra.mxu0 %v28_v15 }
  0x1a   :  { %61 = vmatpush.msra.mxu0 %v27_v16 }
  0x1c   :  { %62 = vmatpush.msra.mxu0 %v26_v17 }
  0x1e   :  { %63 = vmatpush.msra.mxu0 %v25_v18 }
  0x20   :  { %64 = vmatpush.msra.mxu0 %v24_v19 }
  0x21   :  { %65 = vmatmul.f32.vlgmr.msra.gmra.mxu0 %v20_v20 }
  0x29   :  { %68 = vmatmul.f32.gmra.mxu0 %v22_v21 }
  0x83   :  { %v89_v24 = vpop.f32.mrf.mxu1 }
  0x8b   :  { %v92_v27 = vpop.f32.mrf.mxu1 }
  0x9e   :  { %v66_v25 = vpop.f32.mrf.mxu0 }
  0x9f   :  { %v90_v26 = vadd.f32 %v89_v24, %v66_v25 }
  0xa1   :  { %247 = vmatmul.msk.f32.vlgmr.msra.gmra.mxu2 %vm97_vm2, %v90_v26 }
  0xa6   :  { %v69_v28 = vpop.f32.mrf.mxu0 }
  0xa7   :  { %v93_v29 = vadd.f32 %v92_v27, %v69_v28 }
  0xa9   :  { %248 = vmatmul.msk.f32.gmra.mxu2 %vm97_vm2, %v93_v29 }
 0x124   :  { %v125_v34 = vpop.f32.mrf.mxu2 }
 0x125   :  { %v131_v35 = vmax.f32 %v125_v34, 0.0 }
 0x127   :  { %250 = vmatmul.msk.f32.vlgmr.msra.gmra.mxu3 %vm134_vm4, %v131_v35 }
 0x12c   :  { %v128_v36 = vpop.f32.mrf.mxu2 }
 0x12d   :  { %v132_v37 = vmax.f32 %v128_v36, 0.0 }
 0x12f   :  { %251 = vmatmul.msk.f32.gmra.mxu3 %vm134_vm4, %v132_v37 }
 0x1aa   :  { %v162_v39 = vpop.f32.mrf.mxu3 }
 0x1ab   :  { %v168_v40 = vmax.f32 %v162_v39, 0.0 }
 0x1ad   :  { %253 = vmatmul.msk.f32.vlgmr.msrb.gmra.mxu3 %vm97_vm2, %v168_v40  ;;  %256 = vmatmul.msk.f32.vlgmr.msrb.gmra.mxu1 %vm97_vm2, %v168_v40 }
 0x1b2   :  { %v165_v41 = vpop.f32.mrf.mxu3 }
 0x1b3   :  { %v169_v42 = vmax.f32 %v165_v41, 0.0 }
 0x1b5   :  { %254 = vmatmul.msk.f32.gmra.mxu3 %vm97_vm2, %v169_v42  ;;  %257 = vmatmul.msk.f32.gmra.mxu1 %vm97_vm2, %v169_v42 }
 0x22a   :  { %v226_v43 = vpop.f32.mrf.mxu1 }
 0x22b   :  { %v233_v44 = vmul.f32 %v226_v43, %v312_v7 }
 0x22d   :  { %237 = vst.msk [vmem:[%s413_s5 + $0x8] sm:$0xff] %vm42_vm0, %v233_v44 }
 0x230   :  { %v203_v45 = vpop.f32.mrf.mxu3 }
 0x231   :  { %v232_v46 = vmul.f32 %v203_v45, %v20_v20 }
 0x232   :  { %v229_v47 = vpop.f32.mrf.mxu1 }
 0x233   :  { %236 = vst [vmem:[%s413_s5] sm:$0xff] %v232_v46  ;;  %v235_v48 = vmul.f32 %v229_v47, %v331_v12 }
 0x235   :  { %239 = vst.msk [vmem:[%s413_s5 + $0x18] sm:$0xff] %vm42_vm0, %v235_v48 }
 0x238   :  { %v206_v49 = vpop.f32.mrf.mxu3 }
 0x239   :  { %v234_v50 = vmul.f32 %v206_v49, %v22_v21 }
 0x23b   :  { %238 = vst [vmem:[%s413_s5 + $0x10] sm:$0xff] %v234_v50 }

</bundles_post_ra>
